<compile_context>
chip_gen: v7x
topology: tpu7x:2x2x1
jax: 0.10.0
libtpu: 0.0.40
codegen_flags: <defaults>
</compile_context>

<pallas_src>
import functools
import math

import jax
import jax.numpy as jnp
from jax.experimental import pallas as pl
from jax.experimental.pallas import tpu as pltpu

_HALF_LOG_2PI = 0.5 * math.log(2.0 * math.pi)


# ---------------------------------------------------------------------------
# In-kernel special functions (elementwise; EUP usage minimized).
# ---------------------------------------------------------------------------
def _lgamma_digamma(x):
    """(log Gamma(x), psi(x)) for x >= 1 via 4-step shift + Stirling/asymptotic series.

    Shift sums are a single running product / partial fraction built from VPU mul/adds
    (f32-safe for x up to ~4e9).  EUP cost per element: 2 logs + 1 divide — the shift
    reciprocal and 1/z share a single divide.  Series truncation error < 1e-7 for z >= 5.
    """
    num = jnp.ones_like(x)
    den = x
    for k in (1.0, 2.0, 3.0):
        t = x + k
        num = num * t + den          # partial-fraction sum: num/den += 1/t
        den = den * t                # den = x (x+1) (x+2) (x+3)

    z = x + 4.0                      # z >= 5 for x >= 1
    logz = jnp.log(z)
    log_den = jnp.log(den)           # = sum_{k=0..3} log(x+k)
    r = 1.0 / (den * z)              # one divide serves both 1/z and the shift sum
    zi = den * r                     # = 1/z
    dg_shift = (num * z) * r         # = sum_{k=0..3} 1/(x+k)

    zi2 = zi * zi
    lgamma = ((z - 0.5) * logz - z + _HALF_LOG_2PI
              + zi * (1.0 / 12.0 - zi2 * (1.0 / 360.0 - zi2 * (1.0 / 1260.0)))
              - log_den)
    digamma = (logz - 0.5 * zi
               - zi2 * (1.0 / 12.0 - zi2 * (1.0 / 120.0 - zi2 * (1.0 / 252.0)))
               - dg_shift)
    return lgamma, digamma


# ---------------------------------------------------------------------------
# Kernel: one (pixel-tile, batch) slab per grid step; lane-parallel accumulation
# into per-pixel-tile output blocks (resident across the inner batch axis).
# ---------------------------------------------------------------------------
def _mse_bayes_risk_kernel(coeff_ref, ev_ref, tg_ref, loss_ref, msk_ref,
                           *, ignore_index, num_classes, hw):
    jt = pl.program_id(0)            # pixel-tile index (outer, parallel)
    nb = pl.program_id(1)            # batch index (inner, arbitrary)
    tile = ev_ref.shape[2]

    ev = ev_ref[0].astype(jnp.float32)      # (C, tile) evidence
    tg = tg_ref[0].astype(jnp.float32)      # (C, tile) one-hot targets
    coeff = coeff_ref[0]                    # scalar kl_div_coeff from SMEM

    # ---- MSE Bayes-risk term --------------------------------------------
    alpha = ev + 1.0
    S = jnp.sum(alpha, axis=0, keepdims=True)         # (1, tile)
    r = 1.0 / (S * (S + 1.0))                          # one divide for both 1/S, 1/(S+1)
    s_inv = (S + 1.0) * r
    s1_inv = S * r
    pred = alpha * s_inv
    err = jnp.square(tg - pred)
    var = pred * (1.0 - pred) * s1_inv
    mse = jnp.sum(err + var, axis=0, keepdims=True)    # (1, tile)

    # ---- KL divergence prior term ---------------------------------------
    alpha_kl = tg + (1.0 - tg) * alpha                 # (C, tile), >= 1
    akl_sum = jnp.sum(alpha_kl, axis=0, keepdims=True)
    # TODO(synk): stack alpha_kl and akl_sum into one (C+1, tile) array so a single
    # _lgamma_digamma call covers both (saves a full vreg-group of EUP work per tile
    # when C is not a multiple of 8), at the cost of a sublane-offset concat/slice.
    lg_akl, dg_akl = _lgamma_digamma(alpha_kl)
    lg_sum, dg_sum = _lgamma_digamma(akl_sum)
    lg_const = math.lgamma(float(num_classes))         # lgamma(sum of ones over C)
    kl_log = lg_sum - lg_const - jnp.sum(lg_akl, axis=0, keepdims=True)
    # sum_c (a_c-1)(psi(a_c)-psi(S)) = sum_c (a_c-1) psi(a_c) - psi(S) (S - C)
    kl_dig = (jnp.sum((alpha_kl - 1.0) * dg_akl, axis=0, keepdims=True)
              - dg_sum * (akl_sum - float(num_classes)))
    kl = kl_log + kl_dig                               # (1, tile)

    # ---- ignore_index / padding mask (trace-time skipped when dead) -------
    msk = None
    if 0 <= ignore_index < num_classes:
        row_idx = jax.lax.broadcasted_iota(jnp.int32, tg.shape, 0)
        max_val = jnp.max(tg, axis=0, keepdims=True)
        arg = jnp.min(jnp.where(tg == max_val, row_idx, num_classes),
                      axis=0, keepdims=True)
        msk = (arg != ignore_index).astype(jnp.float32)
    if hw % tile != 0:
        col = jt * tile + jax.lax.broadcasted_iota(jnp.int32, (1, tile), 1)
        valid = (col < hw).astype(jnp.float32)
        msk = valid if msk is None else msk * valid

    loss_pix = mse + coeff * kl                        # (1, tile)

    @pl.when(nb == 0)
    def _():
        loss_ref[...] = jnp.zeros_like(loss_ref)
        msk_ref[...] = jnp.zeros_like(msk_ref)

    if msk is None:
        loss_ref[...] += loss_pix[None]
        msk_ref[...] += 1.0
    else:
        loss_ref[...] += (loss_pix * msk)[None]
        msk_ref[...] += msk[None]


# ---------------------------------------------------------------------------
# Wrapper (glue: contiguous reshape, tile sizing, pallas_call, tiny epilogue).
# ---------------------------------------------------------------------------
def mse_bayes_risk_loss(evidence, targets, kl_div_coeff, *,
                        ignore_index=-100, tile=8192):
    """reduction='mean' variant of MSEBayesRiskLoss. evidence/targets are NCHW."""
    # TODO(synk): reduction='none' (per-pixel (N,H,W) loss map) not implemented.
    N, C, H, W = evidence.shape
    HW = H * W

    # Contiguous, transpose-free layout change: (N, C, H, W) -> (N, C, H*W).
    ev = evidence.reshape(N, C, HW)
    tg = targets.reshape(N, C, HW)

    # Tile sizing: multiple of 128 lanes, as large as useful, but budgeted so
    # 2 inputs x 2 pipeline buffers x C*tile*4B stays well under v7x's 32 MiB
    # scoped-VMEM default (v5e/v6e have much more headroom).
    hw_128 = ((HW + 127) // 128) * 128
    vmem_cap_tile = max(128, (8 * 1024 * 1024) // (16 * C) // 128 * 128)
    tile = max(128, min((tile // 128) * 128, vmem_cap_tile, hw_128))
    hw_pad = ((HW + tile - 1) // tile) * tile
    if hw_pad != HW:
        pad = hw_pad - HW
        ev = jnp.pad(ev, ((0, 0), (0, 0), (0, pad)))
        tg = jnp.pad(tg, ((0, 0), (0, 0), (0, pad)))

    n_tiles = hw_pad // tile
    coeff = jnp.asarray([kl_div_coeff], dtype=jnp.float32)
    kernel = functools.partial(_mse_bayes_risk_kernel,
                               ignore_index=ignore_index, num_classes=C, hw=HW)

    loss_part, msk_part = pl.pallas_call(
        kernel,
        out_shape=(jax.ShapeDtypeStruct((n_tiles, 1, tile), jnp.float32),
                   jax.ShapeDtypeStruct((n_tiles, 1, tile), jnp.float32)),
        grid_spec=pltpu.PrefetchScalarGridSpec(
            num_scalar_prefetch=0,
            grid=(n_tiles, N),
            in_specs=[
                pl.BlockSpec(memory_space=pltpu.MemorySpace.SMEM),        # kl_div_coeff (1,)
                pl.BlockSpec((1, C, tile), lambda jt, nb: (nb, 0, jt)),   # evidence (N, C, HWp)
                pl.BlockSpec((1, C, tile), lambda jt, nb: (nb, 0, jt)),   # targets  (N, C, HWp)
            ],
            out_specs=[
                pl.BlockSpec((1, 1, tile), lambda jt, nb: (jt, 0, 0)),    # per-tile loss sums
                pl.BlockSpec((1, 1, tile), lambda jt, nb: (jt, 0, 0)),    # per-tile mask sums
            ],
        ),
        compiler_params=pltpu.CompilerParams(
            dimension_semantics=("parallel", "arbitrary")),
    )(coeff, ev, tg)

    # Tiny XLA epilogue: cross-lane / cross-tile sum + 'mean' division.
    return jnp.sum(loss_part) / jnp.sum(msk_part)


# ---------------------------------------------------------------------------
# Pure-JAX reference (mirrors the PyTorch forward, reduction='mean').
# ---------------------------------------------------------------------------
def _reference(evidence, targets, kl_div_coeff, ignore_index=-100):
    from jax.scipy.special import gammaln, digamma
    alpha = evidence + 1.0
    S = jnp.sum(alpha, axis=1, keepdims=True)
    pred = alpha / S
    err = jnp.square(targets - pred)
    var = pred * (1.0 - pred) / (S + 1.0)
    mse = jnp.sum(err + var, axis=1)
    alpha_kl = targets + (1.0 - targets) * alpha
    akl_sum = jnp.sum(alpha_kl, axis=1, keepdims=True)
    ones = jnp.ones_like(alpha)
    kl_log = (gammaln(akl_sum) - gammaln(jnp.sum(ones, axis=1, keepdims=True))
              - jnp.sum(gammaln(alpha_kl), axis=1, keepdims=True))
    kl_dig = jnp.sum((alpha_kl - 1.0) * (digamma(alpha_kl) - digamma(akl_sum)),
                     axis=1, keepdims=True)
    kl = jnp.squeeze(kl_log + kl_dig, axis=1)
    idx = jnp.argmax(targets, axis=1)
    msk = (idx != ignore_index).astype(jnp.float32)
    loss = (mse + kl_div_coeff * kl) * msk
    return loss.sum() / msk.sum()


if __name__ == "__main__":
    key = jax.random.PRNGKey(0)
    k_ev, k_lb = jax.random.split(key)

    N, C, H, W = 2, 4, 16, 16
    # Evidence is non-negative (standard evidential-DL output, e.g. softplus head).
    evidence = jax.nn.softplus(jax.random.normal(k_ev, (N, C, H, W), dtype=jnp.float32))
    labels = jax.random.randint(k_lb, (N, H, W), 0, C)
    targets = jax.nn.one_hot(labels, C, axis=1, dtype=jnp.float32)   # NCHW one-hot
    kl_div_coeff = 0.5

    out = mse_bayes_risk_loss(evidence, targets, kl_div_coeff)
    out = jax.block_until_ready(out)

    ref = jax.block_until_ready(_reference(evidence, targets, kl_div_coeff))
    assert jnp.isfinite(out), "kernel produced non-finite loss"
    assert jnp.allclose(out, ref, rtol=1e-4, atol=1e-4), (out, ref)

    print("KERNEL_OK")
</pallas_src>

<mosaic_0001>
module attributes {stable_mosaic.version = 11 : i64} {
  func.func @_mse_bayes_risk_kernel(%arg0: i32, %arg1: i32, %arg2: memref<1xf32, #tpu.memory_space<smem>>, %arg3: memref<1x4x256xf32, #tpu.memory_space<vmem>>, %arg4: memref<1x4x256xf32, #tpu.memory_space<vmem>>, %arg5: memref<1x1x256xf32, #tpu.memory_space<vmem>>, %arg6: memref<1x1x256xf32, #tpu.memory_space<vmem>>) attributes {dimension_semantics = [#tpu.dimension_semantics<parallel>, #tpu.dimension_semantics<arbitrary>], iteration_bounds = array<i64: 1, 2>, scalar_prefetch = 0 : i64, scratch_operands = 0 : i64, tpu.core_type = #tpu.core_type<tc>, window_params = [{transform_indices = @transform_0, window_bounds = array<i64: 1>}, {transform_indices = @transform_1, window_bounds = array<i64: 1, 4, 256>}, {transform_indices = @transform_2, window_bounds = array<i64: 1, 4, 256>}, {transform_indices = @transform_3, window_bounds = array<i64: 1, 1, 256>}, {transform_indices = @transform_4, window_bounds = array<i64: 1, 1, 256>}]} {
    %c0 = arith.constant 0 : index
    %c0_0 = arith.constant 0 : index
    %c0_1 = arith.constant 0 : index
    %0 = vector.load %arg3[%c0, %c0_0, %c0_1] : memref<1x4x256xf32, #tpu.memory_space<vmem>>, vector<1x4x256xf32>
    %1 = vector.shape_cast %0 : vector<1x4x256xf32> to vector<4x256xf32>
    %c0_2 = arith.constant 0 : index
    %c0_3 = arith.constant 0 : index
    %c0_4 = arith.constant 0 : index
    %2 = vector.load %arg4[%c0_2, %c0_3, %c0_4] : memref<1x4x256xf32, #tpu.memory_space<vmem>>, vector<1x4x256xf32>
    %3 = vector.shape_cast %2 : vector<1x4x256xf32> to vector<4x256xf32>
    %c0_5 = arith.constant 0 : index
    %4 = memref.load %arg2[%c0_5] : memref<1xf32, #tpu.memory_space<smem>>
    %cst = arith.constant 1.000000e+00 : f32
    %5 = vector.broadcast %cst : f32 to vector<4x256xf32>
    %6 = arith.addf %1, %5 : vector<4x256xf32>
    %cst_6 = arith.constant dense<0.000000e+00> : vector<256xf32>
    %7 = vector.multi_reduction <add>, %6, %cst_6 [0] : vector<4x256xf32> to vector<256xf32>
    %8 = vector.shape_cast %7 : vector<256xf32> to vector<1x256xf32>
    %cst_7 = arith.constant 1.000000e+00 : f32
    %9 = vector.broadcast %cst_7 : f32 to vector<1x256xf32>
    %10 = arith.addf %8, %9 : vector<1x256xf32>
    %11 = arith.mulf %8, %10 : vector<1x256xf32>
    %cst_8 = arith.constant 1.000000e+00 : f32
    %12 = vector.broadcast %cst_8 : f32 to vector<1x256xf32>
    %13 = arith.divf %12, %11 : vector<1x256xf32>
    %cst_9 = arith.constant 1.000000e+00 : f32
    %14 = vector.broadcast %cst_9 : f32 to vector<1x256xf32>
    %15 = arith.addf %8, %14 : vector<1x256xf32>
    %16 = arith.mulf %15, %13 : vector<1x256xf32>
    %17 = arith.mulf %8, %13 : vector<1x256xf32>
    %18 = vector.broadcast %16 : vector<1x256xf32> to vector<4x256xf32>
    %19 = arith.mulf %6, %18 : vector<4x256xf32>
    %20 = arith.subf %3, %19 : vector<4x256xf32>
    %21 = arith.mulf %20, %20 : vector<4x256xf32>
    %cst_10 = arith.constant 1.000000e+00 : f32
    %22 = vector.broadcast %cst_10 : f32 to vector<4x256xf32>
    %23 = arith.subf %22, %19 : vector<4x256xf32>
    %24 = arith.mulf %19, %23 : vector<4x256xf32>
    %25 = vector.broadcast %17 : vector<1x256xf32> to vector<4x256xf32>
    %26 = arith.mulf %24, %25 : vector<4x256xf32>
    %27 = arith.addf %21, %26 : vector<4x256xf32>
    %cst_11 = arith.constant dense<0.000000e+00> : vector<256xf32>
    %28 = vector.multi_reduction <add>, %27, %cst_11 [0] : vector<4x256xf32> to vector<256xf32>
    %29 = vector.shape_cast %28 : vector<256xf32> to vector<1x256xf32>
    %cst_12 = arith.constant 1.000000e+00 : f32
    %30 = vector.broadcast %cst_12 : f32 to vector<4x256xf32>
    %31 = arith.subf %30, %3 : vector<4x256xf32>
    %32 = arith.mulf %31, %6 : vector<4x256xf32>
    %33 = arith.addf %3, %32 : vector<4x256xf32>
    %cst_13 = arith.constant dense<0.000000e+00> : vector<256xf32>
    %34 = vector.multi_reduction <add>, %33, %cst_13 [0] : vector<4x256xf32> to vector<256xf32>
    %35 = vector.shape_cast %34 : vector<256xf32> to vector<1x256xf32>
    %cst_14 = arith.constant 1.000000e+00 : f32
    %36 = vector.broadcast %cst_14 : f32 to vector<4x256xf32>
    %cst_15 = arith.constant 1.000000e+00 : f32
    %37 = vector.broadcast %cst_15 : f32 to vector<4x256xf32>
    %38 = arith.addf %33, %37 : vector<4x256xf32>
    %39 = arith.mulf %36, %38 : vector<4x256xf32>
    %40 = arith.addf %39, %33 : vector<4x256xf32>
    %41 = arith.mulf %33, %38 : vector<4x256xf32>
    %cst_16 = arith.constant 2.000000e+00 : f32
    %42 = vector.broadcast %cst_16 : f32 to vector<4x256xf32>
    %43 = arith.addf %33, %42 : vector<4x256xf32>
    %44 = arith.mulf %40, %43 : vector<4x256xf32>
    %45 = arith.addf %44, %41 : vector<4x256xf32>
    %46 = arith.mulf %41, %43 : vector<4x256xf32>
    %cst_17 = arith.constant 3.000000e+00 : f32
    %47 = vector.broadcast %cst_17 : f32 to vector<4x256xf32>
    %48 = arith.addf %33, %47 : vector<4x256xf32>
    %49 = arith.mulf %45, %48 : vector<4x256xf32>
    %50 = arith.addf %49, %46 : vector<4x256xf32>
    %51 = arith.mulf %46, %48 : vector<4x256xf32>
    %cst_18 = arith.constant 4.000000e+00 : f32
    %52 = vector.broadcast %cst_18 : f32 to vector<4x256xf32>
    %53 = arith.addf %33, %52 : vector<4x256xf32>
    %54 = math.log %53 : vector<4x256xf32>
    %55 = math.log %51 : vector<4x256xf32>
    %56 = arith.mulf %51, %53 : vector<4x256xf32>
    %cst_19 = arith.constant 1.000000e+00 : f32
    %57 = vector.broadcast %cst_19 : f32 to vector<4x256xf32>
    %58 = arith.divf %57, %56 : vector<4x256xf32>
    %59 = arith.mulf %51, %58 : vector<4x256xf32>
    %60 = arith.mulf %50, %53 : vector<4x256xf32>
    %61 = arith.mulf %60, %58 : vector<4x256xf32>
    %62 = arith.mulf %59, %59 : vector<4x256xf32>
    %cst_20 = arith.constant 5.000000e-01 : f32
    %63 = vector.broadcast %cst_20 : f32 to vector<4x256xf32>
    %64 = arith.subf %53, %63 : vector<4x256xf32>
    %65 = arith.mulf %64, %54 : vector<4x256xf32>
    %66 = arith.subf %65, %53 : vector<4x256xf32>
    %cst_21 = arith.constant 0.918938517 : f32
    %67 = vector.broadcast %cst_21 : f32 to vector<4x256xf32>
    %68 = arith.addf %66, %67 : vector<4x256xf32>
    %cst_22 = arith.constant 7.93650805E-4 : f32
    %69 = vector.broadcast %cst_22 : f32 to vector<4x256xf32>
    %70 = arith.mulf %62, %69 : vector<4x256xf32>
    %cst_23 = arith.constant 0.00277777785 : f32
    %71 = vector.broadcast %cst_23 : f32 to vector<4x256xf32>
    %72 = arith.subf %71, %70 : vector<4x256xf32>
    %73 = arith.mulf %62, %72 : vector<4x256xf32>
    %cst_24 = arith.constant 0.0833333358 : f32
    %74 = vector.broadcast %cst_24 : f32 to vector<4x256xf32>
    %75 = arith.subf %74, %73 : vector<4x256xf32>
    %76 = arith.mulf %59, %75 : vector<4x256xf32>
    %77 = arith.addf %68, %76 : vector<4x256xf32>
    %78 = arith.subf %77, %55 : vector<4x256xf32>
    %cst_25 = arith.constant 5.000000e-01 : f32
    %79 = vector.broadcast %cst_25 : f32 to vector<4x256xf32>
    %80 = arith.mulf %79, %59 : vector<4x256xf32>
    %81 = arith.subf %54, %80 : vector<4x256xf32>
    %cst_26 = arith.constant 0.0039682542 : f32
    %82 = vector.broadcast %cst_26 : f32 to vector<4x256xf32>
    %83 = arith.mulf %62, %82 : vector<4x256xf32>
    %cst_27 = arith.constant 0.00833333377 : f32
    %84 = vector.broadcast %cst_27 : f32 to vector<4x256xf32>
    %85 = arith.subf %84, %83 : vector<4x256xf32>
    %86 = arith.mulf %62, %85 : vector<4x256xf32>
    %cst_28 = arith.constant 0.0833333358 : f32
    %87 = vector.broadcast %cst_28 : f32 to vector<4x256xf32>
    %88 = arith.subf %87, %86 : vector<4x256xf32>
    %89 = arith.mulf %62, %88 : vector<4x256xf32>
    %90 = arith.subf %81, %89 : vector<4x256xf32>
    %91 = arith.subf %90, %61 : vector<4x256xf32>
    %cst_29 = arith.constant 1.000000e+00 : f32
    %92 = vector.broadcast %cst_29 : f32 to vector<1x256xf32>
    %cst_30 = arith.constant 1.000000e+00 : f32
    %93 = vector.broadcast %cst_30 : f32 to vector<1x256xf32>
    %94 = arith.addf %35, %93 : vector<1x256xf32>
    %95 = arith.mulf %92, %94 : vector<1x256xf32>
    %96 = arith.addf %95, %35 : vector<1x256xf32>
    %97 = arith.mulf %35, %94 : vector<1x256xf32>
    %cst_31 = arith.constant 2.000000e+00 : f32
    %98 = vector.broadcast %cst_31 : f32 to vector<1x256xf32>
    %99 = arith.addf %35, %98 : vector<1x256xf32>
    %100 = arith.mulf %96, %99 : vector<1x256xf32>
    %101 = arith.addf %100, %97 : vector<1x256xf32>
    %102 = arith.mulf %97, %99 : vector<1x256xf32>
    %cst_32 = arith.constant 3.000000e+00 : f32
    %103 = vector.broadcast %cst_32 : f32 to vector<1x256xf32>
    %104 = arith.addf %35, %103 : vector<1x256xf32>
    %105 = arith.mulf %101, %104 : vector<1x256xf32>
    %106 = arith.addf %105, %102 : vector<1x256xf32>
    %107 = arith.mulf %102, %104 : vector<1x256xf32>
    %cst_33 = arith.constant 4.000000e+00 : f32
    %108 = vector.broadcast %cst_33 : f32 to vector<1x256xf32>
    %109 = arith.addf %35, %108 : vector<1x256xf32>
    %110 = math.log %109 : vector<1x256xf32>
    %111 = math.log %107 : vector<1x256xf32>
    %112 = arith.mulf %107, %109 : vector<1x256xf32>
    %cst_34 = arith.constant 1.000000e+00 : f32
    %113 = vector.broadcast %cst_34 : f32 to vector<1x256xf32>
    %114 = arith.divf %113, %112 : vector<1x256xf32>
    %115 = arith.mulf %107, %114 : vector<1x256xf32>
    %116 = arith.mulf %106, %109 : vector<1x256xf32>
    %117 = arith.mulf %116, %114 : vector<1x256xf32>
    %118 = arith.mulf %115, %115 : vector<1x256xf32>
    %cst_35 = arith.constant 5.000000e-01 : f32
    %119 = vector.broadcast %cst_35 : f32 to vector<1x256xf32>
    %120 = arith.subf %109, %119 : vector<1x256xf32>
    %121 = arith.mulf %120, %110 : vector<1x256xf32>
    %122 = arith.subf %121, %109 : vector<1x256xf32>
    %cst_36 = arith.constant 0.918938517 : f32
    %123 = vector.broadcast %cst_36 : f32 to vector<1x256xf32>
    %124 = arith.addf %122, %123 : vector<1x256xf32>
    %cst_37 = arith.constant 7.93650805E-4 : f32
    %125 = vector.broadcast %cst_37 : f32 to vector<1x256xf32>
    %126 = arith.mulf %118, %125 : vector<1x256xf32>
    %cst_38 = arith.constant 0.00277777785 : f32
    %127 = vector.broadcast %cst_38 : f32 to vector<1x256xf32>
    %128 = arith.subf %127, %126 : vector<1x256xf32>
    %129 = arith.mulf %118, %128 : vector<1x256xf32>
    %cst_39 = arith.constant 0.0833333358 : f32
    %130 = vector.broadcast %cst_39 : f32 to vector<1x256xf32>
    %131 = arith.subf %130, %129 : vector<1x256xf32>
    %132 = arith.mulf %115, %131 : vector<1x256xf32>
    %133 = arith.addf %124, %132 : vector<1x256xf32>
    %134 = arith.subf %133, %111 : vector<1x256xf32>
    %cst_40 = arith.constant 5.000000e-01 : f32
    %135 = vector.broadcast %cst_40 : f32 to vector<1x256xf32>
    %136 = arith.mulf %135, %115 : vector<1x256xf32>
    %137 = arith.subf %110, %136 : vector<1x256xf32>
    %cst_41 = arith.constant 0.0039682542 : f32
    %138 = vector.broadcast %cst_41 : f32 to vector<1x256xf32>
    %139 = arith.mulf %118, %138 : vector<1x256xf32>
    %cst_42 = arith.constant 0.00833333377 : f32
    %140 = vector.broadcast %cst_42 : f32 to vector<1x256xf32>
    %141 = arith.subf %140, %139 : vector<1x256xf32>
    %142 = arith.mulf %118, %141 : vector<1x256xf32>
    %cst_43 = arith.constant 0.0833333358 : f32
    %143 = vector.broadcast %cst_43 : f32 to vector<1x256xf32>
    %144 = arith.subf %143, %142 : vector<1x256xf32>
    %145 = arith.mulf %118, %144 : vector<1x256xf32>
    %146 = arith.subf %137, %145 : vector<1x256xf32>
    %147 = arith.subf %146, %117 : vector<1x256xf32>
    %cst_44 = arith.constant 1.79175949 : f32
    %148 = vector.broadcast %cst_44 : f32 to vector<1x256xf32>
    %149 = arith.subf %134, %148 : vector<1x256xf32>
    %cst_45 = arith.constant dense<0.000000e+00> : vector<256xf32>
    %150 = vector.multi_reduction <add>, %78, %cst_45 [0] : vector<4x256xf32> to vector<256xf32>
    %151 = vector.shape_cast %150 : vector<256xf32> to vector<1x256xf32>
    %152 = arith.subf %149, %151 : vector<1x256xf32>
    %cst_46 = arith.constant 1.000000e+00 : f32
    %153 = vector.broadcast %cst_46 : f32 to vector<4x256xf32>
    %154 = arith.subf %33, %153 : vector<4x256xf32>
    %155 = arith.mulf %154, %91 : vector<4x256xf32>
    %cst_47 = arith.constant dense<0.000000e+00> : vector<256xf32>
    %156 = vector.multi_reduction <add>, %155, %cst_47 [0] : vector<4x256xf32> to vector<256xf32>
    %157 = vector.shape_cast %156 : vector<256xf32> to vector<1x256xf32>
    %cst_48 = arith.constant 4.000000e+00 : f32
    %158 = vector.broadcast %cst_48 : f32 to vector<1x256xf32>
    %159 = arith.subf %35, %158 : vector<1x256xf32>
    %160 = arith.mulf %147, %159 : vector<1x256xf32>
    %161 = arith.subf %157, %160 : vector<1x256xf32>
    %162 = arith.addf %152, %161 : vector<1x256xf32>
    %163 = vector.broadcast %4 : f32 to vector<1x256xf32>
    %164 = arith.mulf %163, %162 : vector<1x256xf32>
    %165 = arith.addf %29, %164 : vector<1x256xf32>
    %c0_i32 = arith.constant 0 : i32
    %166 = arith.cmpi eq, %arg1, %c0_i32 : i32
    %167 = arith.extui %166 : i1 to i32
    %c0_i32_49 = arith.constant 0 : i32
    %168 = arith.cmpi ne, %167, %c0_i32_49 : i32
    scf.if %168 {
      %cst_63 = arith.constant 0.000000e+00 : f32
      %177 = vector.broadcast %cst_63 : f32 to vector<1x1x256xf32>
      %c0_64 = arith.constant 0 : index
      %c0_65 = arith.constant 0 : index
      %c0_66 = arith.constant 0 : index
      %178 = vector.load %arg5[%c0_64, %c0_65, %c0_66] : memref<1x1x256xf32, #tpu.memory_space<vmem>>, vector<1x1x256xf32>
      tpu.vector_store %arg5[%c0_64, %c0_65, %c0_66], %177 {strides = array<i32>} : memref<1x1x256xf32, #tpu.memory_space<vmem>>, vector<1x1x256xf32>,
      %cst_67 = arith.constant 0.000000e+00 : f32
      %179 = vector.broadcast %cst_67 : f32 to vector<1x1x256xf32>
      %c0_68 = arith.constant 0 : index
      %c0_69 = arith.constant 0 : index
      %c0_70 = arith.constant 0 : index
      %180 = vector.load %arg6[%c0_68, %c0_69, %c0_70] : memref<1x1x256xf32, #tpu.memory_space<vmem>>, vector<1x1x256xf32>
      tpu.vector_store %arg6[%c0_68, %c0_69, %c0_70], %179 {strides = array<i32>} : memref<1x1x256xf32, #tpu.memory_space<vmem>>, vector<1x1x256xf32>,
    } else {
    }
    %c0_50 = arith.constant 0 : index
    %c0_51 = arith.constant 0 : index
    %c0_52 = arith.constant 0 : index
    %169 = vector.load %arg5[%c0_50, %c0_51, %c0_52] : memref<1x1x256xf32, #tpu.memory_space<vmem>>, vector<1x1x256xf32>
    %170 = vector.shape_cast %165 : vector<1x256xf32> to vector<1x1x256xf32>
    %171 = arith.addf %169, %170 : vector<1x1x256xf32>
    %c0_53 = arith.constant 0 : index
    %c0_54 = arith.constant 0 : index
    %c0_55 = arith.constant 0 : index
    %172 = vector.load %arg5[%c0_53, %c0_54, %c0_55] : memref<1x1x256xf32, #tpu.memory_space<vmem>>, vector<1x1x256xf32>
    tpu.vector_store %arg5[%c0_53, %c0_54, %c0_55], %171 {strides = array<i32>} : memref<1x1x256xf32, #tpu.memory_space<vmem>>, vector<1x1x256xf32>,
    %c0_56 = arith.constant 0 : index
    %c0_57 = arith.constant 0 : index
    %c0_58 = arith.constant 0 : index
    %173 = vector.load %arg6[%c0_56, %c0_57, %c0_58] : memref<1x1x256xf32, #tpu.memory_space<vmem>>, vector<1x1x256xf32>
    %cst_59 = arith.constant 1.000000e+00 : f32
    %174 = vector.broadcast %cst_59 : f32 to vector<1x1x256xf32>
    %175 = arith.addf %173, %174 : vector<1x1x256xf32>
    %c0_60 = arith.constant 0 : index
    %c0_61 = arith.constant 0 : index
    %c0_62 = arith.constant 0 : index
    %176 = vector.load %arg6[%c0_60, %c0_61, %c0_62] : memref<1x1x256xf32, #tpu.memory_space<vmem>>, vector<1x1x256xf32>
    tpu.vector_store %arg6[%c0_60, %c0_61, %c0_62], %175 {strides = array<i32>} : memref<1x1x256xf32, #tpu.memory_space<vmem>>, vector<1x1x256xf32>,
    return
  }
  func.func @transform_0(%arg0: i32, %arg1: i32) -> i32 {
    %c0_i32 = arith.constant 0 : i32
    %c0_i32_0 = arith.constant 0 : i32
    return %c0_i32 : i32
  }
  func.func @transform_1(%arg0: i32, %arg1: i32) -> (i32, i32, i32) {
    %c0_i32 = arith.constant 0 : i32
    %c0_i32_0 = arith.constant 0 : i32
    return %arg1, %c0_i32, %arg0 : i32, i32, i32
  }
  func.func @transform_2(%arg0: i32, %arg1: i32) -> (i32, i32, i32) {
    %c0_i32 = arith.constant 0 : i32
    %c0_i32_0 = arith.constant 0 : i32
    return %arg1, %c0_i32, %arg0 : i32, i32, i32
  }
  func.func @transform_3(%arg0: i32, %arg1: i32) -> (i32, i32, i32) {
    %c0_i32 = arith.constant 0 : i32
    %c0_i32_0 = arith.constant 0 : i32
    %c0_i32_1 = arith.constant 0 : i32
    return %arg0, %c0_i32, %c0_i32_0 : i32, i32, i32
  }
  func.func @transform_4(%arg0: i32, %arg1: i32) -> (i32, i32, i32) {
    %c0_i32 = arith.constant 0 : i32
    %c0_i32_0 = arith.constant 0 : i32
    %c0_i32_1 = arith.constant 0 : i32
    return %arg0, %c0_i32, %c0_i32_0 : i32, i32, i32
  }
}

</mosaic_0001>

<bundles_post_ra>
// kernel: tpu_custom_call.1
= control target key start
LH: loop header
LB: loop body
LE: loop exit
PB: predicated region body
PF: predicated region fallthrough
CT: control target
= control target key end

     0   :  { %s1410_s0 = inlined_call_operand.<no memory space> [shape: f32[1], index: 0, kind: input, shape index: {}]   ;;  %s1411_s1 = inlined_call_operand.hbm [shape: f32[2,4,256], index: 1, kind: input, shape index: {}]   ;;  %s1412_s2 = inlined_call_operand.hbm [shape: f32[2,4,256], index: 2, kind: input, shape index: {}]   ;;  %s1413_s3 = inlined_call_operand.hbm [shape: f32[1,1,256], index: 3, kind: output, shape index: {0}]   ;;  %s1414_s4 = inlined_call_operand.hbm [shape: f32[1,1,256], index: 4, kind: output, shape index: {1}]  }
   0x1   :  { %10 = sst [smem:[#allocation2]] %s1410_s0 }
   0x2   :  { %11 = vsyncpa [#allocation4], 0 }
   0x3   :  { %13 = vsyncpa [#allocation4 + $0x1], 0 }
   0x4   :  { %14 = vsyncpa [#allocation7], 0 }
   0x5   :  { %16 = vsyncpa [#allocation7 + $0x1], 0 }
   0x6   :  { %17 = vsyncpa [#allocation5], 0 }
   0x7   :  { %18 = vsyncpa [#allocation10], 0  ;;  %s1042_s17 = smov 0   ;;  %s1044_s18 = smov 0  }
   0x8   :  { %s1046_s19 = smov 0   ;;  %s1048_s20 = smov 0  }
   0x9   :  { %s1050_s21 = smov 0   ;;  %s1052_s22 = smov 0  }
   0xa LB: > { %s705_s0 = sadd.s32 4294967295, %s1006_s22   ;;  %s33_s23 = sadd.s32 1, %s1002_s21  ;;  %s1006_s22 = sphi %s1052_s22, %s24_s22   ;;  %s1002_s21 = sphi %s1050_s21, %s1431_s21   ;;  %s998_s20 = sphi %s1048_s20, %s1430_s20   ;;  %s994_s19 = sphi %s1046_s19, %s1429_s19   ;;  %s990_s18 = sphi %s1044_s18, %s1428_s18   ;;  %s986_s17 = sphi %s1042_s17, %s1427_s17  }
   0xb   : > { %p34_p0 = scmp.ge.s32.totalorder %s33_s23, 2  ;;  %s66_s24 = sadd.s32 1, %s994_s19 }
   0xc   : > { %p73_p1 = scmp.ne.s32.totalorder %s994_s19, %s990_s18  ;;  %p74_p2 = scmp.eq.s32.totalorder %s1006_s22, 0 }
   0xd   : > { %s1433_s23 = smov (%p34_p0, %s33_s23), 0  ;;  %p79_p4 = scmp.ne.s32.totalorder %s990_s18, %s986_s17 }
   0xe   : > { %p1078_p3 = por %p74_p2, %p73_p1  ;;  %s61_s26 = ssub.s32 %s1002_s21, %s1433_s23 }
   0xf   : > { %p80_p5 = scmp.eq.s32.totalorder %s705_s0, 0  ;;  %p64_p6 = scmp.eq.s32.totalorder %s61_s26, 0 }
  0x10   : > { %p753_p8 = scmp.lt.s32.totalorder %s1006_s22, 2  ;;  %s1096_s29 = sand.u32 1, %s994_s19  }
  0x11   : > { %p1087_p7 = por %p80_p5, %p79_p4  ;;  %s732_s30 = sshll.u32 %s1002_s21, 7 }
  0x12   : > { %s1093_s28 = scalar_select %p64_p6, %s994_s19, %s66_s24  }
  0x13   : > { %s1417_s27 = scalar_select %p1087_p7, 1, 0 }
  0x14   : > { %s708_s5 = sshll.u32 %s1096_s29, 3  ;;  %s1105_s8 = scalar_lea.hbm %s1411_s1, %s732_s30 }
  0x15   : > { %s190_s9 = scalar_lea.vmem [#allocation3], %s708_s5  ;;  %p1111_p9 = pnand %p753_p8, %p1078_p3 }
  0x16   : > { %s200_s10 = sshll.u32 %s190_s9, 4  ;;  %s187_s12 = scalar_lea.sflag [#allocation4], %s1096_s29  ;;  %s1115_s10 = int_to_ptr.vmem [resolvable:$true] %s200_s10 }
  0x17   : > { %s832_s13 = scalar_lea.hbm %s1105_s8, 128  ;;  %p834_p13 = pneg %p1111_p9 }
  0x18   : > { %p833_p12 = scmp.ne.s32.totalorder %s1105_s8, %s832_s13  ;;  %s837_s16 = scalar_lea.hbm %s1411_s1, 256 }
  0x19   : > { %p838_p2 = scmp.lt.u32.totalorder %s1105_s8, %s1411_s1  ;;  %p839_p3 = scmp.lt.u32.totalorder %s837_s16, %s832_s13 }
  0x1a   : > { %p835_p0 = pnand %p834_p13, %p833_p12  ;;  %p841_p5 = scmp.lt.u32.totalorder %s832_s13, %s1105_s8 }
  0x1b   : > { %p840_p4 = por %p839_p3, %p838_p2 }
  0x1c   : > { %p836_p1 = pneg %p835_p0 }
  0x1d   : > { %p842_p6 = por %p841_p5, %p840_p4 }
  0x1f   : > { %p843_p8 = pnand %p842_p6, %p836_p1 }
  0x21   : > { %846 = shalt.err (!%p843_p8)
}
  0x22   : > { %s847_s25 = scalar_lea.vmem %s1115_s10, 128  ;;  %s1008_s26 = smov [#allocation3]  }
  0x23   : > { %p848_p12 = scmp.ne.s32.totalorder %s1115_s10, %s847_s25  ;;  %s852_s6 = sshll.u32 %s1008_s26, 4  ;;  %s853_s6 = int_to_ptr.vmem [resolvable:$false] %s852_s6 }
  0x24   : > { %s854_s7 = scalar_lea.vmem %s853_s6, 256  ;;  %p855_p11 = scmp.lt.s32.totalorder %s1115_s10, %s853_s6 }
  0x25   : > { %p850_p0 = pnand %p848_p12, %p834_p13  ;;  %p856_p2 = scmp.lt.s32.totalorder %s854_s7, %s847_s25 }
  0x27   : > { %p851_p10 = pneg %p850_p0  ;;  %p857_p3 = por %p856_p2, %p855_p11 }
  0x29   : > { %p858_p4 = pnand %p857_p3, %p851_p10 }
  0x2b   : > { %861 = shalt.err (!%p858_p4)
}
  0x2c   : > { %749 = dma.hbm_to_vmem [thread:$0]  (!%p1111_p9), %s1105_s8, 128, %s1115_s10, %s187_s12  }
  0x2d   : > { %p1419_p1 = scmp.lt.s32.totalorder %s1006_s22, 3  ;;  %p1420_p5 = scmp.ge.s32.totalorder %s1006_s22, 1 }
  0x2e   : > { %s1158_s15 = scalar_lea.hbm %s1412_s2, %s732_s30  ;;  %s211_s16 = scalar_lea.vmem [#allocation6], %s708_s5 }
  0x2f   : > { %p1149_p6 = pnand %p1420_p5, %p1419_p1  ;;  %s221_s17 = sshll.u32 %s211_s16, 4  ;;  %s222_s17 = int_to_ptr.vmem [resolvable:$true] %s221_s17 }
  0x30   : > { %s208_s8 = scalar_lea.sflag [#allocation7], %s1096_s29  ;;  %s862_s10 = scalar_lea.hbm %s1158_s15, 128 }
  0x31   : > { %s1421_s9 = scalar_select %p1149_p6, 1, 0 }
  0x32   : > { %p863_p10 = scmp.ne.s32.totalorder %s1158_s15, %s862_s10  ;;  %s867_s30 = scalar_lea.hbm %s1412_s2, 256 }
  0x33   : > { %p868_p12 = scmp.lt.u32.totalorder %s1158_s15, %s1412_s2  ;;  %p869_p0 = scmp.lt.u32.totalorder %s867_s30, %s862_s10 }
  0x34   : > { %p865_p11 = pnand %p863_p10, %p834_p13  ;;  %p871_p3 = scmp.lt.u32.totalorder %s862_s10, %s1158_s15 }
  0x35   : > { %p870_p2 = por %p869_p0, %p868_p12 }
  0x36   : > { %p866_p8 = pneg %p865_p11 }
  0x37   : > { %p872_p4 = por %p871_p3, %p870_p2 }
  0x39   : > { %p873_p1 = pnand %p872_p4, %p866_p8 }
  0x3b   : > { %876 = shalt.err (!%p873_p1)
}
  0x3c   : > { %s877_s29 = scalar_lea.vmem %s222_s17, 128  ;;  %s1009_s5 = smov [#allocation6]  }
  0x3d   : > { %p878_p5 = scmp.ne.s32.totalorder %s222_s17, %s877_s29  ;;  %s882_s6 = sshll.u32 %s1009_s5, 4  ;;  %s883_s6 = int_to_ptr.vmem [resolvable:$false] %s882_s6 }
  0x3e   : > { %s884_s7 = scalar_lea.vmem %s883_s6, 256  ;;  %p885_p7 = scmp.lt.s32.totalorder %s222_s17, %s883_s6 }
  0x3f   : > { %p880_p10 = pnand %p878_p5, %p834_p13  ;;  %p886_p6 = scmp.lt.s32.totalorder %s884_s7, %s877_s29 }
  0x41   : > { %p881_p11 = pneg %p880_p10  ;;  %p887_p0 = por %p886_p6, %p885_p7 }
  0x43   : > { %p888_p12 = pnand %p887_p0, %p881_p11 }
  0x45   : > { %891 = shalt.err (!%p888_p12)
}
  0x46   : > { %752 = dma.hbm_to_vmem [thread:$0]  (!%p1111_p9), %s1158_s15, 128, %s222_s17, %s208_s8  }
  0x47   : > { %p1422_p8 = scmp.ne.s32.totalorder %s1421_s9, 0 }
  0x48   : > { %s232_s13 = sand.u32 (!%p1422_p8), 1, %s990_s18   ;;  %p1423_p13 = scmp.ne.s32.totalorder (!%p1422_p8), %s1417_s27, 0 }
  0x49   : > { %230 = sbr.rel (%p1422_p8) target bundleno = 212 (0xd4), region = 32  ;;  %s715_s14 = sshll.u32 (!%p1422_p8), %s232_s13, 3 }
  0x4a   : > { %s233_s16 = scalar_lea.sflag (!%p1422_p8), [#allocation4], %s232_s13  ;;  %s236_s10 = scalar_lea.vmem (!%p1422_p8), [#allocation3], %s715_s14 }
  0x50   : > { %969 = dma.done.wait (%p1423_p13), %s233_s16, 128  }
  0x51   : > { %971 = vsyncadd (%p1423_p13), %s233_s16, 4294967168  ;;  %s242_s12 = scalar_lea.sflag [#allocation7], %s232_s13  ;;  %s245_s24 = scalar_lea.vmem [#allocation6], %s715_s14 }
  0x52   : > { %973 = dma.done.wait (%p1423_p13), %s242_s12, 128  }
  0x53   : > { %975 = vsyncadd (%p1423_p13), %s242_s12, 4294967168  ;;  %v272_v0 = vld [vmem:[%s236_s10] sm:$0xff]  ;;  %v1193_v1 = vld [vmem:[%s245_s24] sm:$0xff]  ;;  %vm279_vm0 = vcmask 1043456   ;;  %s274_s27 = sld [smem:[#allocation2]]  ;;  %p725_p7 = scmp.ne.s32.totalorder %s998_s20, 0 }
  0x54   : > { %v1195_v2 = vadd.f32 1.0, %v272_v0  ;;  %v338_v3 = vsub.f32 1.0, %v1193_v1 }
  0x56   : > { %v277_v4 = vcombine.high %v1195_v2, %v1195_v2  ;;  %v280_v5 = vsel %vm279_vm0, %v1195_v2, 0.0  ;;  %v339_v6 = vmul.f32 %v338_v3, %v1195_v2 }
  0x57   : > { %v281_v7 = vrot.slane %v280_v5, 4 }
  0x58   : > { %v287_v8 = vsel %vm279_vm0, %v277_v4, 0.0  ;;  %v1205_v9 = vadd.f32 %v339_v6, %v1193_v1 }
  0x59   : > { %v282_v10 = vadd.f32 %v281_v7, %v280_v5  ;;  %v288_v11 = vrot.slane %v287_v8, 4 }
  0x5a   : > { %v342_v12 = vcombine.high %v1205_v9, %v1205_v9  ;;  %v344_v13 = vsel %vm279_vm0, %v1205_v9, 0.0  ;;  %v358_v14 = vadd.f32 1.0, %v1205_v9  ;;  %v361_v15 = vadd.f32 2.0, %v1205_v9 }
  0x5b   : > { %v283_v16 = vrot.slane %v282_v10, 2  ;;  %v289_v17 = vadd.f32 %v288_v11, %v287_v8  ;;  %v345_v18 = vrot.slane %v344_v13, 4  ;;  %v1216_v21 = vadd.f32 3.0, %v1205_v9 }
  0x5c   : > { %v351_v19 = vsel %vm279_vm0, %v342_v12, 0.0  ;;  %v360_v20 = vmul.f32 %v358_v14, %v1205_v9  ;;  %v1221_v27 = vadd.f32 4.0, %v1205_v9  ;;  %v359_v46 = vadd.f32 %v358_v14, %v1205_v9 }
  0x5d   : > { %v284_v22 = vadd.f32 %v283_v16, %v282_v10  ;;  %v290_v23 = vrot.slane %v289_v17, 2  ;;  %v346_v24 = vadd.f32 %v345_v18, %v344_v13  ;;  %v352_v25 = vrot.slane %v351_v19, 4 }
  0x5e   : > { %v1218_v26 = vmul.f32 %v361_v15, %v360_v20  ;;  %810 = vlog2.f32 %v1221_v27  ;;  %v362_v56 = vmul.f32 %v361_v15, %v359_v46  ;;  %v717_v62 = vadd.f32 -0.5, %v1221_v27 }
  0x5f   : > { %v285_v28 = vrot.slane %v284_v22, 1  ;;  %v291_v29 = vadd.f32 %v290_v23, %v289_v17  ;;  %v347_v30 = vrot.slane %v346_v24, 2  ;;  %v353_v31 = vadd.f32 %v352_v25, %v351_v19 }
  0x60   : > { %v368_v32 = vmul.f32 %v1216_v21, %v1218_v26  ;;  %v363_v4 = vadd.f32 %v362_v56, %v360_v20 }
  0x61   : > { %v286_v33 = vadd.f32 %v285_v28, %v284_v22  ;;  %v292_v34 = vrot.slane %v291_v29, 1  ;;  %v348_v35 = vadd.f32 %v347_v30, %v346_v24  ;;  %v354_v36 = vrot.slane %v353_v31, 2 }
  0x62   : > { %v374_v37 = vmul.f32 %v1221_v27, %v368_v32  ;;  %v366_v16 = vmul.f32 %v1216_v21, %v363_v4 }
  0x63   : > { %v293_v38 = vadd.f32 %v292_v34, %v291_v29  ;;  %v294_v39 = vadd.f32 1.0, %v286_v33  ;;  %v349_v40 = vrot.slane %v348_v35, 1  ;;  %v355_v41 = vadd.f32 %v354_v36, %v353_v31 }
  0x64   : > { %812 = vrcp.f32 %v374_v37  ;;  %v367_v34 = vadd.f32 %v366_v16, %v1218_v26 }
  0x65   : > { %v295_v42 = vadd.f32 1.0, %v293_v38  ;;  %v296_v43 = vmul.f32 %v294_v39, %v286_v33  ;;  %v1227_v44 = vadd.f32 %v349_v40, %v348_v35  ;;  %v356_v45 = vrot.slane %v355_v41, 1 }
  0x67   : > { %v297_v47 = vmul.f32 %v295_v42, %v293_v38  ;;  %814 = vrcp.f32 %v296_v43  ;;  %v1230_v48 = vadd.f32 %v356_v45, %v355_v41  ;;  %v401_v49 = vadd.f32 1.0, %v1227_v44 }
  0x68   : > { %v407_v50 = vadd.f32 2.0, %v1227_v44  ;;  %v811_v52 = vpop.eup %810  ;;  %v415_v55 = vadd.f32 3.0, %v1227_v44  ;;  %v1245_v60 = vadd.f32 4.0, %v1227_v44 }
  0x69   : > { %816 = vrcp.f32 %v297_v47  ;;  %v402_v51 = vadd.f32 1.0, %v1230_v48  ;;  %v405_v53 = vmul.f32 %v401_v49, %v1227_v44  ;;  %v408_v54 = vadd.f32 2.0, %v1230_v48 }
  0x6a   : > { %v1242_v59 = vadd.f32 3.0, %v1230_v48  ;;  %v1247_v61 = vmul.f32 0.6931472, %v811_v52  ;;  %818 = vlog2.f32 %v368_v32  ;;  %v1263_v7 = vadd.f32 4.0, %v1230_v48 }
  0x6b   : > { %v406_v57 = vmul.f32 %v402_v51, %v1230_v48  ;;  %v1239_v58 = vmul.f32 %v407_v50, %v405_v53  ;;  %820 = vlog2.f32 %v1245_v60  ;;  %v403_v13 = vadd.f32 %v401_v49, %v1227_v44 }
  0x6c   : > { %v382_v12 = vmul.f32 %v717_v62, %v1247_v61  ;;  %822 = vlog2.f32 %v1263_v7  ;;  %v404_v20 = vadd.f32 %v402_v51, %v1230_v48 }
  0x6d   : > { %v1252_v0 = vmul.f32 %v408_v54, %v406_v57  ;;  %v1255_v3 = vmul.f32 %v415_v55, %v1239_v58  ;;  %v409_v28 = vmul.f32 %v407_v50, %v403_v13 }
  0x6e   : > { %v1250_v63 = vpop.eup %812  ;;  %v383_v24 = vsub.f32 %v382_v12, %v1221_v27  ;;  %v410_v35 = vmul.f32 %v408_v54, %v404_v20 }
  0x6f   : > { %v377_v5 = vmul.f32 %v1250_v63, %v368_v32  ;;  %v1260_v6 = vmul.f32 %v1242_v59, %v1252_v0  ;;  %v433_v8 = vmul.f32 %v1245_v60, %v1255_v3  ;;  %v411_v40 = vadd.f32 %v409_v28, %v405_v53 }
  0x70   : > { %v384_v37 = vadd.f32 0.9189385, %v383_v24  ;;  %v412_v50 = vadd.f32 %v410_v35, %v406_v57  ;;  %v718_v53 = vadd.f32 -0.5, %v1245_v60  ;;  %v1297_v57 = vadd.f32 -1.0, %v1205_v9 }
  0x71   : > { %v815_v10 = vpop.eup %814  ;;  %v1268_v11 = vmul.f32 %v377_v5, %v377_v5  ;;  %v434_v22 = vmul.f32 %v1263_v7, %v1260_v6  ;;  %824 = vrcp.f32 %v433_v8  ;;  %v417_v51 = vmul.f32 %v415_v55, %v411_v40 }
  0x72   : > { %v302_v14 = vmul.f32 %v815_v10, %v294_v39  ;;  %v304_v23 = vmul.f32 %v815_v10, %v286_v33  ;;  %v392_v62 = vmul.f32 0.5, %v377_v5 }
  0x73   : > { %v817_v15 = vpop.eup %816  ;;  %v385_v17 = vmul.f32 0.0007936508, %v1268_v11  ;;  %v394_v18 = vmul.f32 0.003968254, %v1268_v11  ;;  %826 = vrcp.f32 %v434_v22 }
  0x74   : > { %v303_v19 = vmul.f32 %v817_v15, %v295_v42  ;;  %v305_v29 = vmul.f32 %v817_v15, %v293_v38  ;;  %v819_v36 = vpop.eup %818  ;;  %828 = vlog2.f32 %v1255_v3 }
  0x75   : > { %v386_v25 = vsub.f32 0.0027777778, %v385_v17  ;;  %v395_v31 = vsub.f32 0.008333334, %v394_v18  ;;  %v821_v33 = vpop.eup %820  ;;  %v373_v49 = vmul.f32 0.6931472, %v819_v36  ;;  %v393_v18 = vsub.f32 %v1247_v61, %v392_v62 }
  0x76   : > { %v308_v30 = vcombine.low %v302_v14, %v303_v19  ;;  %v317_v43 = vcombine.low %v304_v23, %v305_v29  ;;  %v823_v46 = vpop.eup %822  ;;  %v1286_v52 = vmul.f32 0.6931472, %v821_v33  ;;  %v418_v14 = vmul.f32 %v1242_v59, %v412_v50 }
  0x77   : > { %v387_v21 = vmul.f32 %v386_v25, %v1268_v11  ;;  %v396_v38 = vmul.f32 %v395_v31, %v1268_v11  ;;  %v1291_v8 = vmul.f32 0.6931472, %v823_v46  ;;  %830 = vlog2.f32 %v1260_v6 }
  0x78   : > { %v310_v32 = vmul.f32 %v308_v30, %v1195_v2  ;;  %v378_v2 = vmul.f32 %v1221_v27, %v367_v34  ;;  %v719_v27 = vadd.f32 -0.5, %v1263_v7  ;;  %v449_v17 = vmul.f32 %v718_v53, %v1286_v52 }
  0x79   : > { %v388_v39 = vsub.f32 0.083333336, %v387_v21  ;;  %v397_v4 = vsub.f32 0.083333336, %v396_v38 }
  0x7a   : > { %v311_v41 = vsub.f32 %v1193_v1, %v310_v32  ;;  %v313_v42 = vsub.f32 1.0, %v310_v32  ;;  %v1302_v12 = vmul.f32 %v1250_v63, %v378_v2  ;;  %v451_v28 = vsub.f32 %v449_v17, %v1245_v60 }
  0x7b   : > { %v389_v45 = vmul.f32 %v388_v39, %v377_v5  ;;  %v1289_v54 = vpop.eup %824  ;;  %v419_v5 = vadd.f32 %v417_v51, %v1239_v58  ;;  %v398_v19 = vmul.f32 %v397_v4, %v1268_v11  ;;  %v420_v58 = vadd.f32 %v418_v14, %v1252_v0 }
  0x7c   : > { %v314_v47 = vmul.f32 %v313_v42, %v310_v32  ;;  %v312_v1 = vmul.f32 %v311_v41, %v311_v41  ;;  %v439_v10 = vmul.f32 %v1289_v54, %v1255_v3  ;;  %v450_v3 = vmul.f32 %v719_v27, %v1291_v8 }
  0x7d   : > { %v390_v26 = vadd.f32 %v389_v45, %v384_v37  ;;  %v1299_v55 = vpop.eup %826  ;;  %v441_v25 = vmul.f32 %v1245_v60, %v419_v5  ;;  %v399_v30 = vsub.f32 %v393_v18, %v398_v19  ;;  %v453_v40 = vadd.f32 0.9189385, %v451_v28 }
  0x7e   : > { %v319_v56 = vmul.f32 %v317_v43, %v314_v47  ;;  %v440_v15 = vmul.f32 %v1299_v55, %v1260_v6  ;;  %v445_v16 = vmul.f32 %v439_v10, %v439_v10  ;;  %v452_v6 = vsub.f32 %v450_v3, %v1263_v7  ;;  %v829_v42 = vpop.eup %828 }
  0x7f   : > { %v391_v13 = vsub.f32 %v390_v26, %v373_v49  ;;  %v469_v41 = vmul.f32 0.5, %v439_v10  ;;  %v400_v49 = vsub.f32 %v399_v30, %v1302_v12  ;;  %v430_v18 = vmul.f32 0.6931472, %v829_v42 }
  0x80   : > { %v320_v9 = vadd.f32 %v319_v56, %v312_v1  ;;  %v446_v59 = vmul.f32 %v440_v15, %v440_v15  ;;  %v455_v20 = vmul.f32 0.0007936508, %v445_v16  ;;  %v473_v22 = vmul.f32 0.003968254, %v445_v16 }
  0x81   : > { %v492_v63 = vsel %vm279_vm0, %v391_v13, 0.0  ;;  %v490_v23 = vcombine.high %v391_v13, %v391_v13  ;;  %v470_v51 = vmul.f32 0.5, %v440_v15  ;;  %v831_v56 = vpop.eup %830  ;;  %v471_v4 = vsub.f32 %v1286_v52, %v469_v41 }
  0x82   : > { %v493_v24 = vrot.slane %v492_v63, 4  ;;  %v456_v61 = vmul.f32 0.0007936508, %v446_v59  ;;  %v457_v29 = vsub.f32 0.0027777778, %v455_v20  ;;  %v322_v11 = vcombine.high %v320_v9, %v320_v9 }
  0x83   : > { %v474_v31 = vmul.f32 0.003968254, %v446_v59  ;;  %v475_v21 = vsub.f32 0.008333334, %v473_v22  ;;  %v324_v0 = vsel %vm279_vm0, %v320_v9, 0.0  ;;  %v499_v39 = vsel %vm279_vm0, %v490_v23, 0.0 }
  0x84   : > { %v458_v32 = vsub.f32 0.0027777778, %v456_v61  ;;  %v459_v34 = vmul.f32 %v457_v29, %v445_v16  ;;  %v494_v35 = vadd.f32 %v493_v24, %v492_v63  ;;  %v331_v43 = vsel %vm279_vm0, %v322_v11, 0.0 }
  0x85   : > { %v476_v36 = vsub.f32 0.008333334, %v474_v31  ;;  %v477_v37 = vmul.f32 %v475_v21, %v445_v16  ;;  %v500_v46 = vrot.slane %v499_v39, 4  ;;  %v325_v47 = vrot.slane %v324_v0, 4 }
  0x86   : > { %v460_v33 = vmul.f32 %v458_v32, %v446_v59  ;;  %v461_v60 = vsub.f32 0.083333336, %v459_v34  ;;  %v495_v50 = vrot.slane %v494_v35, 2  ;;  %v332_v62 = vrot.slane %v331_v43, 4 }
  0x87   : > { %v478_v38 = vmul.f32 %v476_v36, %v446_v59  ;;  %v479_v45 = vsub.f32 0.083333336, %v477_v37  ;;  %v501_v1 = vadd.f32 %v500_v46, %v499_v39  ;;  %v442_v13 = vmul.f32 %v1263_v7, %v420_v58 }
  0x88   : > { %v462_v2 = vsub.f32 0.083333336, %v460_v33  ;;  %v463_v26 = vmul.f32 %v461_v60, %v439_v10  ;;  %v454_v14 = vadd.f32 0.9189385, %v452_v6  ;;  %v326_v9 = vadd.f32 %v325_v47, %v324_v0 }
  0x89   : > { %v480_v53 = vsub.f32 0.083333336, %v478_v38  ;;  %v481_v27 = vmul.f32 %v479_v45, %v445_v16  ;;  %v502_v17 = vrot.slane %v501_v1, 2  ;;  %v496_v19 = vadd.f32 %v495_v50, %v494_v35 }
  0x8a   : > { %v464_v5 = vmul.f32 %v462_v2, %v440_v15  ;;  %v509_v12 = vmul.f32 %v1297_v57, %v400_v49  ;;  %v443_v10 = vmul.f32 %v1289_v54, %v441_v25  ;;  %v465_v63 = vadd.f32 %v463_v26, %v453_v40 }
  0x8b   : > { %v472_v3 = vsub.f32 %v1291_v8, %v470_v51  ;;  %v482_v20 = vmul.f32 %v480_v53, %v446_v59  ;;  %v333_v22 = vadd.f32 %v332_v62, %v331_v43  ;;  %v483_v23 = vsub.f32 %v471_v4, %v481_v27 }
  0x8c   : > { %v511_v52 = vcombine.high %v509_v12, %v509_v12  ;;  %v513_v16 = vsel %vm279_vm0, %v509_v12, 0.0  ;;  %v432_v7 = vmul.f32 0.6931472, %v831_v56  ;;  %v466_v58 = vadd.f32 %v464_v5, %v454_v14 }
  0x8d   : > { %v503_v15 = vadd.f32 %v502_v17, %v501_v1  ;;  %v514_v24 = vrot.slane %v513_v16, 4  ;;  %v327_v28 = vrot.slane %v326_v9, 2  ;;  %v444_v61 = vmul.f32 %v1299_v55, %v442_v13 }
  0x8e   : > { %v497_v29 = vrot.slane %v496_v19, 1  ;;  %v520_v57 = vsel %vm279_vm0, %v511_v52, 0.0  ;;  %v467_v54 = vsub.f32 %v465_v63, %v430_v18  ;;  %v484_v25 = vsub.f32 %v472_v3, %v482_v20 }
  0x8f   : > { %v515_v11 = vadd.f32 %v514_v24, %v513_v16  ;;  %v521_v8 = vrot.slane %v520_v57, 4  ;;  %v334_v59 = vrot.slane %v333_v22, 2  ;;  %v485_v30 = vsub.f32 %v483_v23, %v443_v10 }
  0x90   : > { %v723_v31 = vadd.f32 -4.0, %v1227_v44  ;;  %v468_v21 = vsub.f32 %v466_v58, %v432_v7  ;;  %v504_v6 = vrot.slane %v503_v15, 1  ;;  %v328_v35 = vadd.f32 %v327_v28, %v326_v9 }
  0x91   : > { %v516_v32 = vrot.slane %v515_v11, 2  ;;  %v522_v34 = vadd.f32 %v521_v8, %v520_v57  ;;  %v498_v0 = vadd.f32 %v497_v29, %v496_v19  ;;  %v724_v55 = vadd.f32 -4.0, %v1230_v48 }
  0x92   : > { %v486_v36 = vsub.f32 %v484_v25, %v444_v61  ;;  %v720_v37 = vadd.f32 -1.7917595, %v467_v54  ;;  %v335_v33 = vadd.f32 %v334_v59, %v333_v22  ;;  %v529_v60 = vmul.f32 %v723_v31, %v485_v30 }
  0x93   : > { %v517_v39 = vadd.f32 %v516_v32, %v515_v11  ;;  %v523_v40 = vrot.slane %v522_v34, 2  ;;  %v721_v41 = vadd.f32 -1.7917595, %v468_v21  ;;  %v505_v42 = vadd.f32 %v504_v6, %v503_v15 }
  0x94   : > { %v329_v44 = vrot.slane %v328_v35, 1  ;;  %v506_v45 = vsub.f32 %v720_v37, %v498_v0  ;;  %v530_v49 = vmul.f32 %v724_v55, %v486_v36  ;;  %v336_v2 = vrot.slane %v335_v33, 1 }
  0x95   : > { %v518_v43 = vrot.slane %v517_v39, 1  ;;  %v524_v38 = vadd.f32 %v523_v40, %v522_v34  ;;  %v507_v50 = vsub.f32 %v721_v41, %v505_v42  ;;  %v535_v48 = vstv %s274_s27 }
  0x96   : > { %v330_v53 = vadd.f32 %v329_v44, %v328_v35  ;;  %v337_v62 = vadd.f32 %v336_v2, %v335_v33  ;;  %v544_v17 = vlaneseq (!%p725_p7)  ;;  %v1010_v9 = vmov (!%p725_p7), 0.0  }
  0x97   : > { %v519_v46 = vadd.f32 %v518_v43, %v517_v39  ;;  %v525_v47 = vrot.slane %v524_v38, 1 }
  0x98   : > { %vm546_vm1 = vcmp.lt.s32.totalorder (!%p725_p7), %v544_v17, 256 }
  0x99   : > { %v526_v26 = vadd.f32 %v525_v47, %v524_v38  ;;  %v531_v51 = vsub.f32 %v519_v46, %v529_v60  ;;  %548 = vst.msk [vmem:[#allocation8] sm:$0x3] (!%p725_p7), %vm546_vm1, %v1010_v9  ;;  %549 = vst.msk [vmem:[#allocation9] sm:$0x3] (!%p725_p7), %vm546_vm1, %v1010_v9 }
  0x9b   : > { %v532_v1 = vsub.f32 %v526_v26, %v530_v49  ;;  %v533_v56 = vadd.f32 %v531_v51, %v506_v45  ;;  %543 = sbr.rel (%p725_p7) target bundleno = 162 (0xa2), region = 44 }
  0x9d   : > { %v534_v4 = vadd.f32 %v532_v1, %v507_v50  ;;  %v536_v27 = vmul.f32 %v535_v48, %v533_v56 }
  0x9f   : > { %v537_v13 = vmul.f32 %v535_v48, %v534_v4  ;;  %v538_v14 = vadd.f32 %v536_v27, %v330_v53 }
  0xa1   : > { %v539_v5 = vadd.f32 %v537_v13, %v337_v62 }
  0xa2 PF: > { %v557_v18 = vlaneseq  ;;  %v575_v19 = vld [vmem:[#allocation9] sm:$0x3]  ;;  %v1011_v12 = vmov 1966171168   ;;  %p1336_p9 = scmp.eq.s32.totalorder %s705_s0, 1  ;;  %s1012_s20 = smov [#allocation9]  }
  0xa3   : > { %v555_v10 = vunpack.c.l.s4 %v1011_v12  ;;  %v576_v63 = vadd.f32 1.0, %v575_v19  ;;  %v553_v22 = vcombine.low %v538_v14, %v539_v5  ;;  %s602_s9 = sshll.u32 %s1012_s20, 4  ;;  %s603_s9 = int_to_ptr.vmem [resolvable:$true] %s602_s9 }
  0xa4   : > { %v558_v3 = vshrl.u32 %v557_v18, 7  ;;  %vm1340_vm2 = vcmp.lt.s32.totalorder %v557_v18, 256  ;;  %s892_s15 = scalar_lea.vmem %s603_s9, 32  ;;  %p899_p4 = scmp.lt.s32.totalorder %s603_s9, %s603_s9 }
  0xa5   : > { %v556_v23 = vunpack.c.0.s8 %v555_v10  ;;  %577 = vst.msk [vmem:[#allocation9] sm:$0x3] %vm1340_vm2, %v576_v63  ;;  %p893_p6 = scmp.ne.s32.totalorder %s603_s9, %s892_s15  ;;  %p900_p1 = scmp.lt.s32.totalorder %s892_s15, %s892_s15 }
  0xa7   : > { %v559_v52 = vsub.s32 %v556_v23, %v558_v3  ;;  %p894_p2 = pnand %p893_p6, %p1336_p9  ;;  %p901_p5 = por %p900_p1, %p899_p4 }
  0xa9   : > { %p895_p3 = pneg %p894_p2 }
  0xab   : > { %p902_p10 = pnand %p901_p5, %p895_p3 }
  0xad   : > { %905 = shalt.err (!%p902_p10)
}
  0xae   : > { %s906_s8 = scalar_lea.hbm %s1414_s4, 32 }
  0xaf   : > { %p907_p11 = scmp.ne.s32.totalorder %s1414_s4, %s906_s8  ;;  %p912_p8 = scmp.lt.u32.totalorder %s906_s8, %s1414_s4 }
  0xb1   : > { %p908_p0 = pnand %p907_p11, %p1336_p9 }
  0xb3   : > { %p909_p12 = pneg %p908_p0 }
  0xb5   : > { %p914_p13 = pnand %p912_p8, %p909_p12 }
  0xb7   : > { %917 = shalt.err (!%p914_p13)
}
  0xb8   : > { %741 = dma.vmem_to_hbm [thread:$0]  (%p1336_p9), %s603_s9, 32, %s1414_s4, [#allocation10]   ;;  %v560_v16 = vrot.slane %v553_v22, %v559_v52  ;;  %v550_v7 = vld [vmem:[#allocation8] sm:$0x3] }
  0xb9   : > { %s1013_s7 = smov [#allocation8]  }
  0xba   : > { %s588_s13 = sshll.u32 %s1013_s7, 4  ;;  %v567_v58 = vrot.slane %v560_v16, %v559_v52  ;;  %s589_s13 = int_to_ptr.vmem [resolvable:$true] %s588_s13 }
  0xbb   : > { %s918_s14 = scalar_lea.vmem %s589_s13, 32  ;;  %p925_p3 = scmp.lt.s32.totalorder %s589_s13, %s589_s13 }
  0xbc   : > { %v569_v15 = vadd.f32 %v567_v58, %v550_v7  ;;  %p919_p7 = scmp.ne.s32.totalorder %s589_s13, %s918_s14  ;;  %p926_p4 = scmp.lt.s32.totalorder %s918_s14, %s918_s14 }
  0xbe   : > { %574 = vst.msk [vmem:[#allocation8] sm:$0x3] %vm1340_vm2, %v569_v15  ;;  %p920_p6 = pnand %p919_p7, %p1336_p9  ;;  %p927_p1 = por %p926_p4, %p925_p3 }
  0xc0   : > { %p921_p2 = pneg %p920_p6 }
  0xc2   : > { %p928_p5 = pnand %p927_p1, %p921_p2 }
  0xc4   : > { %931 = shalt.err (!%p928_p5)
}
  0xc5   : > { %s932_s12 = scalar_lea.hbm %s1413_s3, 32 }
  0xc6   : > { %p933_p10 = scmp.ne.s32.totalorder %s1413_s3, %s932_s12  ;;  %p938_p12 = scmp.lt.u32.totalorder %s932_s12, %s1413_s3 }
  0xc8   : > { %p934_p11 = pnand %p933_p10, %p1336_p9 }
  0xca   : > { %p935_p0 = pneg %p934_p11 }
  0xcc   : > { %p940_p8 = pnand %p938_p12, %p935_p0 }
  0xce   : > { %943 = shalt.err (!%p940_p8)
}
  0xcf   : > { %739 = dma.vmem_to_hbm [thread:$0]  (%p1336_p9), %s589_s13, 32, %s1413_s3, [#allocation5]  }
  0xd0   : > { %977 = dma.done.wait (%p1336_p9), [#allocation5], 32  }
  0xd1   : > { %979 = vsyncadd (%p1336_p9), [#allocation5], 4294967264 }
  0xd2   : > { %981 = dma.done.wait (%p1336_p9), [#allocation10], 32  }
  0xd3   : > { %983 = vsyncadd (%p1336_p9), [#allocation10], 4294967264 }
  0xd4 PF: > { %s24_s22 = sadd.s32 1, %s1006_s22   ;;  %s1427_s17 = smov %s990_s18 }
  0xd5   : > { %p21_p13 = scmp.ge.s32.totalorder %s24_s22, 4   ;;  %s1428_s18 = smov %s994_s19 }
  0xd6   : > { %s1429_s19 = smov %s1093_s28  ;;  %s1430_s20 = smov %s1002_s21 }
  0xd7   : > { %s1431_s21 = smov %s1433_s23  ;;  %23 = sbr.rel (!%p21_p13) target bundleno = 10 (0xa), region = 96 }
  0xde   :  { %619 = vsyncpa [#allocation4], 1 }
  0xdf   :  { %621 = vsyncpa [#allocation4 + $0x1], 1 }
  0xe0   :  { %622 = vsyncpa [#allocation7], 1 }
  0xe1   :  { %624 = vsyncpa [#allocation7 + $0x1], 1 }
  0xe2   :  { %625 = vsyncpa [#allocation5], 1 }
  0xe3   :  { %627 = vsyncpa [#allocation5 + $0x1], 1 }
  0xe4   :  { %628 = vsyncpa [#allocation10], 1 }

</bundles_post_ra>
